<compile_context>
chip_gen: v7x
topology: tpu7x:2x2x1
jax: 0.10.0
libtpu: 0.0.40
codegen_flags: <defaults>
</compile_context>

<pallas_src>
import jax
import jax.numpy as jnp
from jax.experimental import pallas as pl
from jax.experimental.pallas import tpu as pltpu

H = 128        # hidden width
IN_DIM = 1     # fc1 input features
OUT_DIM = 4    # fc3 real output features
OUT_PAD = 8    # narrow, sublane-aligned padded output width (was 128)
TILE_LADDER = (4096, 2048, 1024, 512)   # candidate batch tiles for large N
SMALL_N = 512  # below this, use a single sublane-aligned tile


def mlp_kernel(x_ref, w1_ref, b1_ref, w2_ref, b2_ref, w3_ref, b3_ref, o_ref):
    # fc1: in_features == 1 -> broadcasted outer product on the VPU (f32).
    #   x: [TM, 1], w1: [1, H]  ->  [TM, H]
    h1 = jnp.maximum(x_ref[...] * w1_ref[...] + b1_ref[...], 0.0)

    # fc2: [TM, H] @ [H, H]  -- bf16 operands into the MXU, f32 accumulate.
    h2 = jnp.dot(h1.astype(jnp.bfloat16), w2_ref[...],
                 preferred_element_type=jnp.float32) + b2_ref[...]
    h2 = jnp.maximum(h2, 0.0)

    # fc3: [TM, H] @ [H, 8]  (zero-padded to 8 lanes) -- narrow masked store is
    # 16x less HBM writeback than the previous 128-lane lane-dense store.
    o_ref[...] = jnp.dot(h2.astype(jnp.bfloat16), w3_ref[...],
                         preferred_element_type=jnp.float32) + b3_ref[...]


def _round_up(n, m):
    return ((n + m - 1) // m) * m


def _choose_tile(n):
    """Pick (tile_m, n_pad): minimize padded rows, prefer the largest tile on
    ties; small batches use a single sublane-aligned tile."""
    if n <= SMALL_N:
        t = _round_up(max(n, 8), 8)
        return t, t
    best_t, best_pad = None, None
    for t in TILE_LADDER:  # descending, so ties keep the largest tile
        n_pad = _round_up(n, t)
        if best_pad is None or n_pad < best_pad:
            best_t, best_pad = t, n_pad
    return best_t, best_pad


def simple_dnn_forward(x, params):
    """x: [N, 1] float32; params: dict of transposed ([in, out]) weights / biases."""
    n = x.shape[0]
    tile_m, n_pad = _choose_tile(n)
    if n_pad != n:
        x = jnp.pad(x, ((0, n_pad - n), (0, 0)))

    w1, b1 = params["w1"], params["b1"]
    w2, b2 = params["w2"], params["b2"]
    w3, b3 = params["w3"], params["b3"]

    # bf16 weights for the MXU-bound matmuls (biases stay f32 for the VPU add).
    w2_bf16 = w2.astype(jnp.bfloat16)
    # Zero-pad fc3 to 8 output lanes (sublane minimum) -> small HBM writeback.
    w3_pad = jnp.pad(w3, ((0, 0), (0, OUT_PAD - OUT_DIM))).astype(jnp.bfloat16)
    b3_pad = jnp.pad(b3, ((0, 0), (0, OUT_PAD - OUT_DIM)))

    grid = (n_pad // tile_m,)
    pinned = lambda shape: pl.BlockSpec(shape, lambda i: (0, 0))  # weights: VMEM-resident

    out = pl.pallas_call(
        mlp_kernel,
        out_shape=jax.ShapeDtypeStruct((n_pad, OUT_PAD), jnp.float32),
        grid=grid,
        in_specs=[
            pl.BlockSpec((tile_m, IN_DIM), lambda i: (i, 0)),  # x       [TM, 1]
            pinned(w1.shape),                                  # w1      [1, H]
            pinned(b1.shape),                                  # b1      [1, H]
            pinned(w2_bf16.shape),                             # w2      [H, H]   bf16
            pinned(b2.shape),                                  # b2      [1, H]
            pinned(w3_pad.shape),                              # w3_pad  [H, 8]   bf16
            pinned(b3_pad.shape),                              # b3_pad  [1, 8]
        ],
        out_specs=pl.BlockSpec((tile_m, OUT_PAD), lambda i: (i, 0)),
        compiler_params=pltpu.CompilerParams(
            dimension_semantics=("parallel",),  # shard batch across TCs on v7x
        ),
    )(x, w1, b1, w2_bf16, b2, w3_pad, b3_pad)

    # Strip batch padding and the (small) lane padding of fc3.
    return out[:n, :OUT_DIM]


def init_params(key):
    """Deterministic init mimicking PyTorch nn.Linear defaults:
    U(-1/sqrt(fan_in), 1/sqrt(fan_in)) for both weight and bias.
    Weights stored transposed as [in, out] so y = x @ W + b."""
    ks = jax.random.split(key, 6)

    def linear(kw, kb, fan_in, fan_out):
        bound = 1.0 / jnp.sqrt(jnp.float32(fan_in))
        w = jax.random.uniform(kw, (fan_in, fan_out), jnp.float32, -bound, bound)
        b = jax.random.uniform(kb, (1, fan_out), jnp.float32, -bound, bound)
        return w, b

    w1, b1 = linear(ks[0], ks[1], IN_DIM, H)
    w2, b2 = linear(ks[2], ks[3], H, H)
    w3, b3 = linear(ks[4], ks[5], H, OUT_DIM)
    return {"w1": w1, "b1": b1, "w2": w2, "b2": b2, "w3": w3, "b3": b3}


def reference_forward(x, p):
    h = jnp.maximum(x @ p["w1"] + p["b1"], 0.0)
    h = jnp.maximum(h @ p["w2"] + p["b2"], 0.0)
    return h @ p["w3"] + p["b3"]


if __name__ == "__main__":
    key = jax.random.PRNGKey(0)
    kx, kx2, kp = jax.random.split(key, 3)
    params = init_params(kp)

    # Small demo batch (latency-floor / single-tile path).
    N = 8
    x = jax.random.uniform(kx, (N, IN_DIM), jnp.float32)  # e.g. time points t in [0,1)
    out = jax.block_until_ready(simple_dnn_forward(x, params))
    ref = reference_forward(x, params)
    assert out.shape == (N, OUT_DIM)
    # bf16 MXU operands with f32 accumulation -> loosened tolerance vs f32 ref.
    assert jnp.allclose(out, ref, atol=3e-2, rtol=3e-2), "mismatch vs reference (small N)"

    # Multi-tile path: exercises the tile ladder, grid > 1 and batch padding.
    N2 = 1056
    x2 = jax.random.uniform(kx2, (N2, IN_DIM), jnp.float32)
    out2 = jax.block_until_ready(simple_dnn_forward(x2, params))
    ref2 = reference_forward(x2, params)
    assert out2.shape == (N2, OUT_DIM)
    assert jnp.allclose(out2, ref2, atol=3e-2, rtol=3e-2), "mismatch vs reference (multi-tile)"

    print("KERNEL_OK")
</pallas_src>

<mosaic_0001>
module attributes {stable_mosaic.version = 11 : i64} {
  func.func @mlp_kernel(%arg0: i32, %arg1: memref<8x1xf32, #tpu.memory_space<vmem>>, %arg2: memref<1x128xf32, #tpu.memory_space<vmem>>, %arg3: memref<1x128xf32, #tpu.memory_space<vmem>>, %arg4: memref<128x128xbf16, #tpu.memory_space<vmem>>, %arg5: memref<1x128xf32, #tpu.memory_space<vmem>>, %arg6: memref<128x8xbf16, #tpu.memory_space<vmem>>, %arg7: memref<1x8xf32, #tpu.memory_space<vmem>>, %arg8: memref<8x8xf32, #tpu.memory_space<vmem>>) attributes {dimension_semantics = [#tpu.dimension_semantics<parallel>], iteration_bounds = array<i64: 1>, scalar_prefetch = 0 : i64, scratch_operands = 0 : i64, tpu.core_type = #tpu.core_type<tc>, window_params = [{transform_indices = @transform_0, window_bounds = array<i64: 8, 1>}, {pipeline_mode = #tpu.pipeline_mode<synchronous>, transform_indices = @transform_1, window_bounds = array<i64: 1, 128>}, {pipeline_mode = #tpu.pipeline_mode<synchronous>, transform_indices = @transform_2, window_bounds = array<i64: 1, 128>}, {pipeline_mode = #tpu.pipeline_mode<synchronous>, transform_indices = @transform_3, window_bounds = array<i64: 128, 128>}, {pipeline_mode = #tpu.pipeline_mode<synchronous>, transform_indices = @transform_4, window_bounds = array<i64: 1, 128>}, {pipeline_mode = #tpu.pipeline_mode<synchronous>, transform_indices = @transform_5, window_bounds = array<i64: 128, 8>}, {pipeline_mode = #tpu.pipeline_mode<synchronous>, transform_indices = @transform_6, window_bounds = array<i64: 1, 8>}, {transform_indices = @transform_7, window_bounds = array<i64: 8, 8>}]} {
    %c0 = arith.constant 0 : index
    %c0_0 = arith.constant 0 : index
    %0 = vector.load %arg1[%c0, %c0_0] : memref<8x1xf32, #tpu.memory_space<vmem>>, vector<8x1xf32>
    %c0_1 = arith.constant 0 : index
    %c0_2 = arith.constant 0 : index
    %1 = vector.load %arg2[%c0_1, %c0_2] : memref<1x128xf32, #tpu.memory_space<vmem>>, vector<1x128xf32>
    %2 = vector.broadcast %0 : vector<8x1xf32> to vector<8x128xf32>
    %3 = vector.broadcast %1 : vector<1x128xf32> to vector<8x128xf32>
    %4 = arith.mulf %2, %3 : vector<8x128xf32>
    %c0_3 = arith.constant 0 : index
    %c0_4 = arith.constant 0 : index
    %5 = vector.load %arg3[%c0_3, %c0_4] : memref<1x128xf32, #tpu.memory_space<vmem>>, vector<1x128xf32>
    %6 = vector.broadcast %5 : vector<1x128xf32> to vector<8x128xf32>
    %7 = arith.addf %4, %6 : vector<8x128xf32>
    %cst = arith.constant 0.000000e+00 : f32
    %8 = vector.broadcast %cst : f32 to vector<8x128xf32>
    %9 = arith.maximumf %7, %8 : vector<8x128xf32>
    %10 = arith.truncf %9 : vector<8x128xf32> to vector<8x128xbf16>
    %c0_5 = arith.constant 0 : index
    %c0_6 = arith.constant 0 : index
    %11 = vector.load %arg4[%c0_5, %c0_6] : memref<128x128xbf16, #tpu.memory_space<vmem>>, vector<128x128xbf16>
    %cst_7 = arith.constant dense<0.000000e+00> : vector<8x128xf32>
    %12 = tpu.matmul %10, %11, %cst_7 {dimension_numbers = #tpu.dot_dimension_numbers<[1], [0], [0], [1], [0, 0, 1, 1], [], []>} : vector<8x128xbf16>, vector<128x128xbf16>, vector<8x128xf32> -> vector<8x128xf32>
    %c0_8 = arith.constant 0 : index
    %c0_9 = arith.constant 0 : index
    %13 = vector.load %arg5[%c0_8, %c0_9] : memref<1x128xf32, #tpu.memory_space<vmem>>, vector<1x128xf32>
    %14 = vector.broadcast %13 : vector<1x128xf32> to vector<8x128xf32>
    %15 = arith.addf %12, %14 : vector<8x128xf32>
    %cst_10 = arith.constant 0.000000e+00 : f32
    %16 = vector.broadcast %cst_10 : f32 to vector<8x128xf32>
    %17 = arith.maximumf %15, %16 : vector<8x128xf32>
    %18 = arith.truncf %17 : vector<8x128xf32> to vector<8x128xbf16>
    %c0_11 = arith.constant 0 : index
    %c0_12 = arith.constant 0 : index
    %19 = vector.load %arg6[%c0_11, %c0_12] : memref<128x8xbf16, #tpu.memory_space<vmem>>, vector<128x8xbf16>
    %cst_13 = arith.constant dense<0.000000e+00> : vector<8x8xf32>
    %20 = tpu.matmul %18, %19, %cst_13 {dimension_numbers = #tpu.dot_dimension_numbers<[1], [0], [0], [1], [0, 0, 1, 1], [], []>} : vector<8x128xbf16>, vector<128x8xbf16>, vector<8x8xf32> -> vector<8x8xf32>
    %c0_14 = arith.constant 0 : index
    %c0_15 = arith.constant 0 : index
    %21 = vector.load %arg7[%c0_14, %c0_15] : memref<1x8xf32, #tpu.memory_space<vmem>>, vector<1x8xf32>
    %22 = vector.broadcast %21 : vector<1x8xf32> to vector<8x8xf32>
    %23 = arith.addf %20, %22 : vector<8x8xf32>
    %c0_16 = arith.constant 0 : index
    %c0_17 = arith.constant 0 : index
    %24 = vector.load %arg8[%c0_16, %c0_17] : memref<8x8xf32, #tpu.memory_space<vmem>>, vector<8x8xf32>
    tpu.vector_store %arg8[%c0_16, %c0_17], %23 {strides = array<i32>} : memref<8x8xf32, #tpu.memory_space<vmem>>, vector<8x8xf32>,
    return
  }
  func.func @transform_0(%arg0: i32) -> (i32, i32) {
    %c0_i32 = arith.constant 0 : i32
    %c0_i32_0 = arith.constant 0 : i32
    return %arg0, %c0_i32 : i32, i32
  }
  func.func @transform_1(%arg0: i32) -> (i32, i32) {
    %c0_i32 = arith.constant 0 : i32
    %c0_i32_0 = arith.constant 0 : i32
    %c0_i32_1 = arith.constant 0 : i32
    return %c0_i32, %c0_i32_0 : i32, i32
  }
  func.func @transform_2(%arg0: i32) -> (i32, i32) {
    %c0_i32 = arith.constant 0 : i32
    %c0_i32_0 = arith.constant 0 : i32
    %c0_i32_1 = arith.constant 0 : i32
    return %c0_i32, %c0_i32_0 : i32, i32
  }
  func.func @transform_3(%arg0: i32) -> (i32, i32) {
    %c0_i32 = arith.constant 0 : i32
    %c0_i32_0 = arith.constant 0 : i32
    %c0_i32_1 = arith.constant 0 : i32
    return %c0_i32, %c0_i32_0 : i32, i32
  }
  func.func @transform_4(%arg0: i32) -> (i32, i32) {
    %c0_i32 = arith.constant 0 : i32
    %c0_i32_0 = arith.constant 0 : i32
    %c0_i32_1 = arith.constant 0 : i32
    return %c0_i32, %c0_i32_0 : i32, i32
  }
  func.func @transform_5(%arg0: i32) -> (i32, i32) {
    %c0_i32 = arith.constant 0 : i32
    %c0_i32_0 = arith.constant 0 : i32
    %c0_i32_1 = arith.constant 0 : i32
    return %c0_i32, %c0_i32_0 : i32, i32
  }
  func.func @transform_6(%arg0: i32) -> (i32, i32) {
    %c0_i32 = arith.constant 0 : i32
    %c0_i32_0 = arith.constant 0 : i32
    %c0_i32_1 = arith.constant 0 : i32
    return %c0_i32, %c0_i32_0 : i32, i32
  }
  func.func @transform_7(%arg0: i32) -> (i32, i32) {
    %c0_i32 = arith.constant 0 : i32
    %c0_i32_0 = arith.constant 0 : i32
    return %arg0, %c0_i32 : i32, i32
  }
}

</mosaic_0001>

<bundles_post_ra>
// kernel: tpu_custom_call.1
= control target key start
LH: loop header
LB: loop body
LE: loop exit
PB: predicated region body
PF: predicated region fallthrough
CT: control target
= control target key end

     0   :  { %v415_v2 = vmov 0   ;;  %v416_v3 = vmov 0.0   ;;  %vm417_vm0 = vmmov 0   ;;  %s534_s0 = inlined_call_operand.vmem [shape: f32[8,1], index: 0, kind: input, shape index: {}]   ;;  %s535_s1 = inlined_call_operand.vmem [shape: f32[1,128], index: 1, kind: input, shape index: {}]   ;;  %s536_s2 = inlined_call_operand.vmem [shape: f32[1,128], index: 2, kind: input, shape index: {}]   ;;  %s537_s3 = inlined_call_operand.vmem [shape: bf16[128,128], index: 3, kind: input, shape index: {}]   ;;  %s538_s4 = inlined_call_operand.vmem [shape: f32[1,128], index: 4, kind: input, shape index: {}]   ;;  %s539_s5 = inlined_call_operand.vmem [shape: bf16[128,8], index: 5, kind: input, shape index: {}]   ;;  %s540_s6 = inlined_call_operand.vmem [shape: f32[1,8], index: 6, kind: input, shape index: {}]   ;;  %s541_s7 = inlined_call_operand.hbm [shape: f32[8,8], index: 7, kind: output, shape index: {}]  }
   0x1   :  { %v28_v0 = vld [vmem:[%s534_s0] sm:$0xff]  ;;  %374 = vset.pattern.permute.xlu0 %v415_v2  ;;  %330 = vmatprep.subr.bf16.mxu0 %v416_v3  ;;  %v376_v4 = vld [vmem:[%s537_s3 + $0x8] sm:$0xff]   ;;  %v377_v5 = vld [vmem:[%s537_s3 + $0x10] sm:$0xff]  }
   0x2   :  { %v375_v1 = vld [vmem:[%s537_s3] sm:$0xff]   ;;  %32 = vperm.xlu0 %374, %v28_v0   ;;  %350 = vmatprep.subr.bf16.mxu1 %v416_v3  ;;  %v378_v6 = vld [vmem:[%s537_s3 + $0x18] sm:$0xff]   ;;  %v384_v8 = vld [vmem:[%s539_s5 + $0x8] sm:$0xff]  }
   0x3   :  { %331 = vmatpush3.bf16.msra.mxu0 %v375_v1  ;;  %346 = vmatprep.mubr.msk.bf16.mxu0 %vm417_vm0, %v416_v3  ;;  %v383_v7 = vld [vmem:[%s539_s5] sm:$0xff]   ;;  %v385_v10 = vld [vmem:[%s539_s5 + $0x10] sm:$0xff]  }
   0x4   :  { %332 = vmatprep.subr.bf16.mxu0 %v416_v3  ;;  %366 = vmatprep.mubr.msk.bf16.mxu1 %vm417_vm0, %v416_v3  ;;  %v379_v9 = vld [vmem:[%s537_s3 + $0x20] sm:$0xff]  }
   0x5   :  { %351 = vmatpush3.bf16.msra.mxu1 %v383_v7 }
   0x6   :  { %352 = vmatprep.subr.bf16.mxu1 %v416_v3 }
   0x7   :  { %333 = vmatpush3.bf16.msra.mxu0 %v376_v4 }
   0x8   :  { %334 = vmatprep.subr.bf16.mxu0 %v416_v3 }
   0x9   :  { %353 = vmatpush3.bf16.msra.mxu1 %v384_v8 }
   0xb   :  { %335 = vmatpush3.bf16.msra.mxu0 %v377_v5 }
   0xc   :  { %336 = vmatprep.subr.bf16.mxu0 %v416_v3 }
   0xf   :  { %337 = vmatpush3.bf16.msra.mxu0 %v378_v6 }
  0x10   :  { %338 = vmatprep.subr.bf16.mxu0 %v416_v3 }
  0x11   :  { %12 = vsyncpa [#allocation3], 0  ;;  %354 = vmatprep.subr.bf16.mxu1 %v416_v3  ;;  %v380_v11 = vld [vmem:[%s537_s3 + $0x28] sm:$0xff]   ;;  %v386_v12 = vld [vmem:[%s539_s5 + $0x18] sm:$0xff]   ;;  %s418_s15 = smov [#allocation2]   ;;  %vm276_vm1 = vcmask 64512  }
  0x12   :  { %355 = vmatpush3.bf16.msra.mxu1 %v385_v10  ;;  %v381_v13 = vld [vmem:[%s537_s3 + $0x30] sm:$0xff]   ;;  %v387_v14 = vld [vmem:[%s539_s5 + $0x20] sm:$0xff]   ;;  %v382_v15 = vld [vmem:[%s537_s3 + $0x38] sm:$0xff]   ;;  %s284_s16 = sshll.u32 %s418_s15, 4  ;;  %s285_s16 = int_to_ptr.vmem [resolvable:$true] %s284_s16 }
  0x13   :  { %339 = vmatpush3.bf16.msra.mxu0 %v379_v9  ;;  %356 = vmatprep.subr.bf16.mxu1 %v416_v3  ;;  %v388_v16 = vld [vmem:[%s539_s5 + $0x28] sm:$0xff]   ;;  %v292_v17 = vld [vmem:[%s535_s1] ss:$0 sm:$0xff]  ;;  %v389_v24 = vld [vmem:[%s539_s5 + $0x30] sm:$0xff]   ;;  %p396_p1 = scmp.lt.s32.totalorder %s285_s16, %s285_s16 }
  0x14   :  { %340 = vmatprep.subr.bf16.mxu0 %v416_v3  ;;  %v293_v18 = vld [vmem:[%s536_s2] ss:$0 sm:$0xff]  ;;  %v390_v25 = vld [vmem:[%s539_s5 + $0x38] sm:$0xff]  }
  0x15   :  { %v294_v26 = vld [vmem:[%s538_s4] ss:$0 sm:$0xff]  ;;  %s391_s4 = scalar_lea.vmem %s285_s16, 128 }
  0x16   :  { %357 = vmatpush3.bf16.msra.mxu1 %v386_v12  ;;  %v303_v34 = vld [vmem:[%s540_s6] ss:$0 sm:$0xff]  ;;  %p392_p0 = scmp.ne.s32.totalorder %s285_s16, %s391_s4  ;;  %p397_p2 = scmp.lt.s32.totalorder %s391_s4, %s391_s4 }
  0x17   :  { %341 = vmatpush3.bf16.msra.mxu0 %v380_v11  ;;  %358 = vmatprep.subr.bf16.mxu1 %v416_v3 }
  0x18   :  { %342 = vmatprep.subr.bf16.mxu0 %v416_v3  ;;  %p398_p3 = por %p397_p2, %p396_p1 }
  0x1a   :  { %359 = vmatpush3.bf16.msra.mxu1 %v387_v14  ;;  %p399_p4 = pnand %p398_p3, %p392_p0 }
  0x1b   :  { %343 = vmatpush3.bf16.msra.mxu0 %v381_v13  ;;  %360 = vmatprep.subr.bf16.mxu1 %v416_v3 }
  0x1c   :  { %344 = vmatprep.subr.bf16.mxu0 %v416_v3 }
  0x1e   :  { %361 = vmatpush3.bf16.msra.mxu1 %v388_v16 }
  0x1f   :  { %345 = vmatpush3.bf16.msra.mxu0 %v382_v15  ;;  %362 = vmatprep.subr.bf16.mxu1 %v416_v3 }
  0x22   :  { %363 = vmatpush3.bf16.msra.mxu1 %v389_v24 }
  0x23   :  { %364 = vmatprep.subr.bf16.mxu1 %v416_v3 }
  0x26   :  { %365 = vmatpush3.bf16.msra.mxu1 %v390_v25 }
  0x81   :  { %v33_v19 = vpop.permute.xlu0 %32 }
  0x82   :  { %v41_v20 = vmul.f32 %v292_v17, %v33_v19 }
  0x84   :  { %v49_v21 = vadd.f32 %v293_v18, %v41_v20 }
  0x86   :  { %v50_v22 = vmax.f32 %v49_v21, 0.0 }
  0x88   :  { %v51_v23 = vpack.c.bf16 %v50_v22, %v50_v22 }
  0x8a   :  { %347 = vmatmul.mubr.bf16.vlgmr.msra.gmra.mrb[0].mxu0 %v51_v23 }
 0x15d   :  { %v157_v27 = vpop.f32.mrb[0].mxu0 }
 0x15e   :  { %v158_v28 = vadd.f32 %v294_v26, %v157_v27  ;;  %v348_v29 = vpop.f32.mrb[1].mxu0 }
 0x15f   :  { %v160_v30 = vpop.f32.mrb[2].mxu0 }
 0x160   :  { %v163_v31 = vmax.f32 %v158_v28, 0.0  ;;  %v349_v32 = vpop.f32.mrb[3].mxu0 }
 0x162   :  { %v164_v33 = vpack.c.bf16 %v163_v31, %v163_v31 }
 0x164   :  { %367 = vmatmul.mubr.bf16.vlgmr.msra.gmra.mrb[0].mxu1 %v164_v33 }
 0x237   :  { %v270_v35 = vpop.f32.mrb[0].mxu1 }
 0x238   :  { %v271_v36 = vadd.f32 %v303_v34, %v270_v35  ;;  %v368_v37 = vpop.f32.mrb[1].mxu1 }
 0x239   :  { %v273_v38 = vpop.f32.mrb[2].mxu1 }
 0x23a   :  { %v369_v39 = vpop.f32.mrb[3].mxu1  ;;  %277 = vst.msk [vmem:[#allocation2] sm:$0xff] %vm276_vm1, %v271_v36 }
 0x23b   :  { %402 = shalt.err (!%p399_p4)
}
 0x23c   :  { %s403_s6 = scalar_lea.hbm %s541_s7, 128 }
 0x23d   :  { %p404_p5 = scmp.ne.s32.totalorder %s541_s7, %s403_s6  ;;  %p407_p6 = scmp.lt.u32.totalorder %s403_s6, %s541_s7 }
 0x23f   :  { %p409_p7 = pnand %p407_p6, %p404_p5 }
 0x241   :  { %412 = shalt.err (!%p409_p7)
}
 0x242   :  { %287 = dma.vmem_to_hbm [thread:$0]  %s285_s16, 128, %s541_s7, [#allocation3]  }
 0x243   :  { %413 = dma.done.wait [#allocation3], 128  }
 0x244   :  { %414 = vsyncadd [#allocation3], 4294967168 }
 0x245   :  { %291 = vsyncpa [#allocation3], 1 }

</bundles_post_ra>
